<compile_context>
chip_gen: v6e
topology: v6e:2x2x1
jax: 0.10.0
libtpu: 0.0.40
codegen_flags: <defaults>
</compile_context>

<pallas_src>
import functools

import jax
import jax.numpy as jnp
from jax.experimental import pallas as pl
from jax.experimental.pallas import tpu as pltpu

_LANE = 128   # lane width: pad the N-side feature dims (H, D_out) to this
_SUB = 8      # sublane width: batch tile must be a multiple of this


def _sigmoid_f32(x):
    # One EUP op (tanh) instead of exp + reciprocal; mul/add go to the VALU.
    return 0.5 * jnp.tanh(0.5 * x) + 0.5


def mlp_kernel(x_ref, w1_ref, b1_ref, w2_ref, b2_ref, o_ref):
    # Layer 1: (TB, D_in)bf16 @ (D_in, Hp)bf16 -> f32 acc, f32 epilogue.
    h = jnp.dot(x_ref[...], w1_ref[...], preferred_element_type=jnp.float32)
    h = _sigmoid_f32(h + b1_ref[...])
    # Layer 2: (TB, Hp)bf16 @ (Hp, Dp_out)bf16 -> f32 acc, f32 epilogue.
    y = jnp.dot(h.astype(jnp.bfloat16), w2_ref[...],
                preferred_element_type=jnp.float32)
    o_ref[...] = _sigmoid_f32(y + b2_ref[...]).astype(o_ref.dtype)


def _round_up(n, m):
    return ((n + m - 1) // m) * m


def _pad2d(a, rows, cols):
    r, c = a.shape
    return jnp.pad(a, ((0, rows - r), (0, cols - c)))


def prepare_params(w1, b1, w2, b2):
    """One-time model setup: pad N-side dims to 128 lanes, cast weights to bf16.

    Padding is exact: padded W1 columns give pre-activations of 0 -> hidden 0.5,
    which multiply all-zero padded W2 rows, so real outputs are uncontaminated.
    """
    d_in, h = w1.shape
    d_out = w2.shape[1]
    hp = _round_up(h, _LANE)
    dp_out = _round_up(d_out, _LANE)
    w1_p = _pad2d(w1, d_in, hp).astype(jnp.bfloat16)        # (D_in, Hp)
    b1_p = _pad2d(b1.reshape(1, -1), 1, hp).astype(jnp.float32)
    w2_p = _pad2d(w2, hp, dp_out).astype(jnp.bfloat16)       # (Hp, Dp_out)
    b2_p = _pad2d(b2.reshape(1, -1), 1, dp_out).astype(jnp.float32)
    return w1_p, b1_p, w2_p, b2_p


def _choose_tb(batch, tb_req):
    """Pick the batch tile: big (amortize ~0.35us/step overhead), but keep >= 2
    grid steps when possible so both v7x TensorCores get work."""
    bp8 = _round_up(batch, _SUB)
    tb = min(_round_up(tb_req, _SUB), bp8)
    if tb >= bp8 and bp8 >= 2 * _SUB:
        tb = _round_up(bp8 // 2, _SUB)
    bp = _round_up(batch, tb)
    return tb, bp


@functools.partial(jax.jit, static_argnames=("d_out", "tb"))
def net_forward(x, w1_p, b1_p, w2_p, b2_p, *, d_out, tb=512):
    """x: (B, D_in) f32/bf16; padded params from prepare_params().

    Returns sigmoid(sigmoid(x @ W1 + b1) @ W2 + b2) as bf16, shape (B, d_out).
    """
    batch, d_in = x.shape
    hp = w1_p.shape[1]
    dp_out = w2_p.shape[1]

    tb, bp = _choose_tb(batch, tb)
    n_blocks = bp // tb

    # Only large streamed operand: cast to bf16 (MXU operand dtype anyway), pad
    # the batch dim only if needed. D_in stays unpadded (block dim == array dim).
    x_p = x.astype(jnp.bfloat16)
    if bp != batch:
        x_p = jnp.pad(x_p, ((0, bp - batch), (0, 0)))

    out_p = pl.pallas_call(
        mlp_kernel,
        out_shape=jax.ShapeDtypeStruct((bp, dp_out), jnp.bfloat16),
        grid=(n_blocks,),
        in_specs=[
            # x: streamed over batch (auto double-buffered).
            pl.BlockSpec((tb, d_in), lambda i: (i, 0)),
            # weights/biases: resident, fetched once, single-buffered.
            pl.BlockSpec((d_in, hp), lambda i: (0, 0),
                         pipeline_mode=pl.Buffered(1)),
            pl.BlockSpec((1, hp), lambda i: (0, 0),
                         pipeline_mode=pl.Buffered(1)),
            pl.BlockSpec((hp, dp_out), lambda i: (0, 0),
                         pipeline_mode=pl.Buffered(1)),
            pl.BlockSpec((1, dp_out), lambda i: (0, 0),
                         pipeline_mode=pl.Buffered(1)),
        ],
        out_specs=pl.BlockSpec((tb, dp_out), lambda i: (i, 0)),
        compiler_params=pltpu.CompilerParams(
            dimension_semantics=("parallel",),
        ),
    )(x_p, w1_p, b1_p, w2_p, b2_p)

    # Trim batch/lane padding. (Callers that can consume the padded slab may
    # skip this slice entirely.)
    return out_p[:batch, :d_out]


def reference_forward(x, w1, b1, w2, b2):
    h = jax.nn.sigmoid(x @ w1 + b1)
    return jax.nn.sigmoid(h @ w2 + b2)


if __name__ == "__main__":
    # Shapes implied by Net(D_in, H, D_out); batch large enough to exercise the
    # batch grid, features small like the original lab.
    B, D_in, H, D_out = 256, 32, 64, 16

    key = jax.random.PRNGKey(0)
    kx, k1, k2, k3, k4 = jax.random.split(key, 5)

    x = jax.random.normal(kx, (B, D_in), dtype=jnp.float32)

    # nn.Linear-style init (uniform in +/- 1/sqrt(fan_in)), deterministic.
    bound1 = 1.0 / (D_in ** 0.5)
    bound2 = 1.0 / (H ** 0.5)
    w1 = jax.random.uniform(k1, (D_in, H), jnp.float32, -bound1, bound1)   # = W1^T
    b1 = jax.random.uniform(k2, (1, H), jnp.float32, -bound1, bound1)
    w2 = jax.random.uniform(k3, (H, D_out), jnp.float32, -bound2, bound2)  # = W2^T
    b2 = jax.random.uniform(k4, (1, D_out), jnp.float32, -bound2, bound2)

    # One-time setup (padding + bf16 casts hoisted out of the per-call path).
    w1_p, b1_p, w2_p, b2_p = prepare_params(w1, b1, w2, b2)
    w1_p, b1_p, w2_p, b2_p = jax.block_until_ready((w1_p, b1_p, w2_p, b2_p))

    out = net_forward(x, w1_p, b1_p, w2_p, b2_p, d_out=D_out, tb=512)
    out = jax.block_until_ready(out)

    ref = reference_forward(x, w1, b1, w2, b2)
    assert out.shape == (B, D_out)
    # bf16 MXU operands + bf16 output on values in [0,1]: error ~4e-3,
    # well inside the 2e-2 inference tolerance.
    err = jnp.max(jnp.abs(out.astype(jnp.float32) - ref))
    assert jnp.allclose(out.astype(jnp.float32), ref, atol=2e-2, rtol=0.0), float(err)

    print("KERNEL_OK")
</pallas_src>

<mosaic_0001>
module attributes {stable_mosaic.version = 11 : i64} {
  func.func @mlp_kernel(%arg0: i32, %arg1: memref<128x32xbf16, #tpu.memory_space<vmem>>, %arg2: memref<32x128xbf16, #tpu.memory_space<vmem>>, %arg3: memref<1x128xf32, #tpu.memory_space<vmem>>, %arg4: memref<128x128xbf16, #tpu.memory_space<vmem>>, %arg5: memref<1x128xf32, #tpu.memory_space<vmem>>, %arg6: memref<128x128xbf16, #tpu.memory_space<vmem>>) attributes {dimension_semantics = [#tpu.dimension_semantics<parallel>], iteration_bounds = array<i64: 2>, scalar_prefetch = 0 : i64, scratch_operands = 0 : i64, tpu.core_type = #tpu.core_type<tc>, window_params = [{transform_indices = @transform_0, window_bounds = array<i64: 128, 32>}, {pipeline_mode = #tpu.pipeline_mode<synchronous>, transform_indices = @transform_1, window_bounds = array<i64: 32, 128>}, {pipeline_mode = #tpu.pipeline_mode<synchronous>, transform_indices = @transform_2, window_bounds = array<i64: 1, 128>}, {pipeline_mode = #tpu.pipeline_mode<synchronous>, transform_indices = @transform_3, window_bounds = array<i64: 128, 128>}, {pipeline_mode = #tpu.pipeline_mode<synchronous>, transform_indices = @transform_4, window_bounds = array<i64: 1, 128>}, {transform_indices = @transform_5, window_bounds = array<i64: 128, 128>}]} {
    %c0 = arith.constant 0 : index
    %c0_0 = arith.constant 0 : index
    %0 = vector.load %arg1[%c0, %c0_0] : memref<128x32xbf16, #tpu.memory_space<vmem>>, vector<128x32xbf16>
    %c0_1 = arith.constant 0 : index
    %c0_2 = arith.constant 0 : index
    %1 = vector.load %arg2[%c0_1, %c0_2] : memref<32x128xbf16, #tpu.memory_space<vmem>>, vector<32x128xbf16>
    %cst = arith.constant dense<0.000000e+00> : vector<128x128xf32>
    %2 = tpu.matmul %0, %1, %cst {dimension_numbers = #tpu.dot_dimension_numbers<[1], [0], [0], [1], [0, 0, 1, 1], [], []>} : vector<128x32xbf16>, vector<32x128xbf16>, vector<128x128xf32> -> vector<128x128xf32>
    %c0_3 = arith.constant 0 : index
    %c0_4 = arith.constant 0 : index
    %3 = vector.load %arg3[%c0_3, %c0_4] : memref<1x128xf32, #tpu.memory_space<vmem>>, vector<1x128xf32>
    %4 = vector.broadcast %3 : vector<1x128xf32> to vector<128x128xf32>
    %5 = arith.addf %2, %4 : vector<128x128xf32>
    %cst_5 = arith.constant 5.000000e-01 : f32
    %6 = vector.broadcast %cst_5 : f32 to vector<128x128xf32>
    %7 = arith.mulf %6, %5 : vector<128x128xf32>
    %8 = math.tanh %7 : vector<128x128xf32>
    %cst_6 = arith.constant 5.000000e-01 : f32
    %9 = vector.broadcast %cst_6 : f32 to vector<128x128xf32>
    %10 = arith.mulf %9, %8 : vector<128x128xf32>
    %cst_7 = arith.constant 5.000000e-01 : f32
    %11 = vector.broadcast %cst_7 : f32 to vector<128x128xf32>
    %12 = arith.addf %10, %11 : vector<128x128xf32>
    %13 = arith.truncf %12 : vector<128x128xf32> to vector<128x128xbf16>
    %c0_8 = arith.constant 0 : index
    %c0_9 = arith.constant 0 : index
    %14 = vector.load %arg4[%c0_8, %c0_9] : memref<128x128xbf16, #tpu.memory_space<vmem>>, vector<128x128xbf16>
    %cst_10 = arith.constant dense<0.000000e+00> : vector<128x128xf32>
    %15 = tpu.matmul %13, %14, %cst_10 {dimension_numbers = #tpu.dot_dimension_numbers<[1], [0], [0], [1], [0, 0, 1, 1], [], []>} : vector<128x128xbf16>, vector<128x128xbf16>, vector<128x128xf32> -> vector<128x128xf32>
    %c0_11 = arith.constant 0 : index
    %c0_12 = arith.constant 0 : index
    %16 = vector.load %arg5[%c0_11, %c0_12] : memref<1x128xf32, #tpu.memory_space<vmem>>, vector<1x128xf32>
    %17 = vector.broadcast %16 : vector<1x128xf32> to vector<128x128xf32>
    %18 = arith.addf %15, %17 : vector<128x128xf32>
    %cst_13 = arith.constant 5.000000e-01 : f32
    %19 = vector.broadcast %cst_13 : f32 to vector<128x128xf32>
    %20 = arith.mulf %19, %18 : vector<128x128xf32>
    %21 = math.tanh %20 : vector<128x128xf32>
    %cst_14 = arith.constant 5.000000e-01 : f32
    %22 = vector.broadcast %cst_14 : f32 to vector<128x128xf32>
    %23 = arith.mulf %22, %21 : vector<128x128xf32>
    %cst_15 = arith.constant 5.000000e-01 : f32
    %24 = vector.broadcast %cst_15 : f32 to vector<128x128xf32>
    %25 = arith.addf %23, %24 : vector<128x128xf32>
    %26 = arith.truncf %25 : vector<128x128xf32> to vector<128x128xbf16>
    %c0_16 = arith.constant 0 : index
    %c0_17 = arith.constant 0 : index
    %27 = vector.load %arg6[%c0_16, %c0_17] : memref<128x128xbf16, #tpu.memory_space<vmem>>, vector<128x128xbf16>
    tpu.vector_store %arg6[%c0_16, %c0_17], %26 {strides = array<i32>} : memref<128x128xbf16, #tpu.memory_space<vmem>>, vector<128x128xbf16>,
    return
  }
  func.func @transform_0(%arg0: i32) -> (i32, i32) {
    %c0_i32 = arith.constant 0 : i32
    %c0_i32_0 = arith.constant 0 : i32
    return %arg0, %c0_i32 : i32, i32
  }
  func.func @transform_1(%arg0: i32) -> (i32, i32) {
    %c0_i32 = arith.constant 0 : i32
    %c0_i32_0 = arith.constant 0 : i32
    %c0_i32_1 = arith.constant 0 : i32
    return %c0_i32, %c0_i32_0 : i32, i32
  }
  func.func @transform_2(%arg0: i32) -> (i32, i32) {
    %c0_i32 = arith.constant 0 : i32
    %c0_i32_0 = arith.constant 0 : i32
    %c0_i32_1 = arith.constant 0 : i32
    return %c0_i32, %c0_i32_0 : i32, i32
  }
  func.func @transform_3(%arg0: i32) -> (i32, i32) {
    %c0_i32 = arith.constant 0 : i32
    %c0_i32_0 = arith.constant 0 : i32
    %c0_i32_1 = arith.constant 0 : i32
    return %c0_i32, %c0_i32_0 : i32, i32
  }
  func.func @transform_4(%arg0: i32) -> (i32, i32) {
    %c0_i32 = arith.constant 0 : i32
    %c0_i32_0 = arith.constant 0 : i32
    %c0_i32_1 = arith.constant 0 : i32
    return %c0_i32, %c0_i32_0 : i32, i32
  }
  func.func @transform_5(%arg0: i32) -> (i32, i32) {
    %c0_i32 = arith.constant 0 : i32
    %c0_i32_0 = arith.constant 0 : i32
    return %arg0, %c0_i32 : i32, i32
  }
}

</mosaic_0001>

<bundles_post_ra>
// kernel: net_forward.1
= control target key start
LH: loop header
LB: loop body
LE: loop exit
PB: predicated region body
PF: predicated region fallthrough
CT: control target
= control target key end

     0   :  { %s1210_s18 = smov 0   ;;  %s1324_s0 = inlined_call_operand.vmem [shape: bf16[256,32], index: 0, kind: input, shape index: {}]   ;;  %s1325_s1 = inlined_call_operand.vmem [shape: bf16[32,128], index: 1, kind: input, shape index: {}]   ;;  %s1326_s2 = inlined_call_operand.vmem [shape: f32[1,128], index: 2, kind: input, shape index: {}]   ;;  %s1327_s3 = inlined_call_operand.vmem [shape: bf16[128,128], index: 3, kind: input, shape index: {}]   ;;  %s1328_s4 = inlined_call_operand.vmem [shape: f32[1,128], index: 4, kind: input, shape index: {}]   ;;  %s1329_s5 = inlined_call_operand.vmem [shape: bf16[256,128], index: 5, kind: output, shape index: {}]  }
   0x1 LB: > { %s870_s19 = sadd.s32 4294967295, %s1178_s18   ;;  %p874_p0 = scmp.ge.s32.totalorder %s1178_s18, 1  ;;  %s1178_s18 = sphi %s1210_s18, %s15_s18  }
   0x2   : > { %p188_p1 = scmp.lt.s32.totalorder %s1178_s18, 3 }
   0x4   : > { %p189_p2 = pnand %p874_p0, %p188_p1 }
   0x5   : > { %s875_s22 = sshll.u32 (!%p189_p2), %s870_s19, 4 }
   0x6   : > { %192 = sbr.rel (%p189_p2) target bundleno = 492 (0x1ec), region = 40  ;;  %p217_p3 = scmp.lt.s32.totalorder (!%p189_p2), %s875_s22, 31 }
   0xb   : > { %v1090_v0 = vld [vmem:[%s1325_s1 + $0x8] sm:$0xff]   ;;  %v1091_v1 = vld [vmem:[%s1325_s1] sm:$0xff]   ;;  %s1331_s22 = smov (!%p217_p3, %s875_s22), 31  ;;  %vm308_vm0 = vcmask 261120   ;;  %v1100_v10 = vld [vmem:[%s1327_s3 + $0x38] sm:$0xff]  }
   0xc   : > { %1014 = vmatprep.subr.bf16.mxu0 %v1090_v0  ;;  %s876_s25 = sshll.u32 %s1331_s22, 2  ;;  %1066 = vmatprep.subr.bf16.mxu1 %v1100_v10  ;;  %v1101_v11 = vld [vmem:[%s1327_s3 + $0x30] sm:$0xff]   ;;  %v1102_v12 = vld [vmem:[%s1327_s3 + $0x28] sm:$0xff]   ;;  %v1103_v13 = vld [vmem:[%s1327_s3 + $0x20] sm:$0xff]  }
   0xd   : > { %1015 = vmatpush3.bf16.msra.mxu0 %v1090_v0  ;;  %s220_s28 = scalar_lea.vmem %s1324_s0, %s876_s25  ;;  %1074 = vmatpush3.bf16.msra.mxu1 %v1100_v10  ;;  %v1104_v14 = vld [vmem:[%s1327_s3 + $0x18] sm:$0xff]   ;;  %v1105_v15 = vld [vmem:[%s1327_s3 + $0x10] sm:$0xff]   ;;  %v1106_v16 = vld [vmem:[%s1327_s3 + $0x8] sm:$0xff]   ;;  %s1308_s29 = scalar_lea.vmem %s1329_s5, %s876_s25 }
   0xe   : > { %1016 = vmatprep.subr.bf16.mxu0 %v1091_v1  ;;  %v1092_v2 = vld [vmem:[%s220_s28] sm:$0xff]   ;;  %v1093_v3 = vld [vmem:[%s220_s28 + $0x8] sm:$0xff]   ;;  %v1094_v4 = vld [vmem:[%s220_s28 + $0x10] sm:$0xff]   ;;  %1067 = vmatprep.subr.bf16.mxu1 %v1101_v11 }
   0xf   : > { %1018 = vmatprep.mubr.msk.bf16.mxu0 %vm308_vm0, %v1092_v2  ;;  %v1095_v5 = vld [vmem:[%s220_s28 + $0x18] sm:$0xff]   ;;  %v1096_v6 = vld [vmem:[%s220_s28 + $0x20] sm:$0xff]   ;;  %v1097_v7 = vld [vmem:[%s220_s28 + $0x28] sm:$0xff]  }
  0x10   : > { %v1098_v8 = vld [vmem:[%s220_s28 + $0x30] sm:$0xff]   ;;  %v1099_v9 = vld [vmem:[%s220_s28 + $0x38] sm:$0xff]   ;;  %v1107_v17 = vld [vmem:[%s1327_s3] sm:$0xff]  }
  0x11   : > { %1017 = vmatpush3.bf16.msra.mxu0 %v1091_v1  ;;  %1075 = vmatpush3.bf16.msra.mxu1 %v1101_v11  ;;  %v1267_v18 = vld [vmem:[%s1326_s2] ss:$0 sm:$0xff] }
  0x12   : > { %1034 = vmatprep.subr.bf16.mxu0 %v1100_v10  ;;  %1068 = vmatprep.subr.bf16.mxu1 %v1102_v12 }
  0x14   : > { %1019 = vmatmul.mubr.msk.bf16.vlgmr.msra.gmra.mxu0 %vm308_vm0, %v1093_v3 }
  0x15   : > { %1022 = vmatprep.mubr.msk.bf16.mxu0 %vm308_vm0, %v1094_v4  ;;  %1035 = vmatpush3.bf16.msra.mxu0 %v1100_v10 }
  0x16   : > { %1036 = vmatprep.subr.bf16.mxu0 %v1101_v11  ;;  %1076 = vmatpush3.bf16.msra.mxu1 %v1102_v12 }
  0x17   : > { %1069 = vmatprep.subr.bf16.mxu1 %v1103_v13 }
  0x19   : > { %1037 = vmatpush3.bf16.msra.mxu0 %v1101_v11 }
  0x1a   : > { %1038 = vmatprep.subr.bf16.mxu0 %v1102_v12  ;;  %1077 = vmatpush3.bf16.msra.mxu1 %v1103_v13 }
  0x1b   : > { %1070 = vmatprep.subr.bf16.mxu1 %v1104_v14 }
  0x1c   : > { %1023 = vmatmul.mubr.msk.bf16.gmra.mxu0 %vm308_vm0, %v1095_v5 }
  0x1d   : > { %1026 = vmatprep.mubr.msk.bf16.mxu0 %vm308_vm0, %v1096_v6  ;;  %1039 = vmatpush3.bf16.msra.mxu0 %v1102_v12 }
  0x1e   : > { %1040 = vmatprep.subr.bf16.mxu0 %v1103_v13  ;;  %1078 = vmatpush3.bf16.msra.mxu1 %v1104_v14 }
  0x1f   : > { %1071 = vmatprep.subr.bf16.mxu1 %v1105_v15 }
  0x21   : > { %1041 = vmatpush3.bf16.msra.mxu0 %v1103_v13 }
  0x22   : > { %1042 = vmatprep.subr.bf16.mxu0 %v1104_v14  ;;  %1079 = vmatpush3.bf16.msra.mxu1 %v1105_v15 }
  0x23   : > { %1072 = vmatprep.subr.bf16.mxu1 %v1106_v16 }
  0x24   : > { %1027 = vmatmul.mubr.msk.bf16.gmra.mxu0 %vm308_vm0, %v1097_v7 }
  0x25   : > { %1030 = vmatprep.mubr.msk.bf16.mxu0 %vm308_vm0, %v1098_v8  ;;  %1043 = vmatpush3.bf16.msra.mxu0 %v1104_v14 }
  0x26   : > { %1044 = vmatprep.subr.bf16.mxu0 %v1105_v15  ;;  %1080 = vmatpush3.bf16.msra.mxu1 %v1106_v16 }
  0x27   : > { %1073 = vmatprep.subr.bf16.mxu1 %v1107_v17 }
  0x29   : > { %1045 = vmatpush3.bf16.msra.mxu0 %v1105_v15 }
  0x2a   : > { %1046 = vmatprep.subr.bf16.mxu0 %v1106_v16  ;;  %1081 = vmatpush3.bf16.msra.mxu1 %v1107_v17 }
  0x2c   : > { %1031 = vmatmul.mubr.msk.bf16.gmra.mxu0 %vm308_vm0, %v1099_v9 }
  0x2d   : > { %1047 = vmatpush3.bf16.msra.mxu0 %v1106_v16 }
  0x2e   : > { %1048 = vmatprep.subr.bf16.mxu0 %v1107_v17 }
  0x31   : > { %1049 = vmatpush3.bf16.msra.mxu0 %v1107_v17 }
  0xd4   : > { %v1020_v19 = vpop.f32.mrf.mxu0 }
  0xd5   : > { %v376_v20 = vadd.f32 %v1020_v19, %v1267_v18 }
  0xd6   : > { %v367_v21 = vpop.f32.mrf.mxu0 }
  0xd7   : > { %v368_v22 = vadd.f32 %v1267_v18, %v367_v21  ;;  %v432_v23 = vmul.f32 0.5, %v376_v20 }
  0xd8   : > { %v1021_v24 = vpop.f32.mrf.mxu0 }
  0xd9   : > { %v430_v25 = vmul.f32 0.5, %v368_v22  ;;  %v379_v26 = vadd.f32 %v1021_v24, %v1267_v18 }
  0xda   : > { %v370_v27 = vpop.f32.mrf.mxu0 }
  0xdb   : > { %1108 = vtanh.f32 %v430_v25  ;;  %v433_v28 = vmul.f32 0.5, %v379_v26  ;;  %v371_v29 = vadd.f32 %v1267_v18, %v370_v27 }
  0xdc   : > { %1110 = vtanh.f32 %v432_v23  ;;  %v1024_v30 = vpop.f32.mrf.mxu0 }
  0xdd   : > { %1112 = vtanh.f32 %v433_v28  ;;  %v431_v31 = vmul.f32 0.5, %v371_v29  ;;  %v392_v32 = vadd.f32 %v1024_v30, %v1267_v18 }
  0xde   : > { %v383_v33 = vpop.f32.mrf.mxu0 }
  0xdf   : > { %1114 = vtanh.f32 %v431_v31  ;;  %v384_v34 = vadd.f32 %v1267_v18, %v383_v33  ;;  %v436_v35 = vmul.f32 0.5, %v392_v32 }
  0xe0   : > { %v1025_v36 = vpop.f32.mrf.mxu0 }
  0xe1   : > { %v434_v37 = vmul.f32 0.5, %v384_v34  ;;  %v395_v38 = vadd.f32 %v1025_v36, %v1267_v18 }
  0xe2   : > { %v386_v39 = vpop.f32.mrf.mxu0 }
  0xe3   : > { %1116 = vtanh.f32 %v434_v37  ;;  %v437_v40 = vmul.f32 0.5, %v395_v38  ;;  %v387_v41 = vadd.f32 %v1267_v18, %v386_v39 }
  0xe4   : > { %1118 = vtanh.f32 %v436_v35  ;;  %v1028_v42 = vpop.f32.mrf.mxu0 }
  0xe5   : > { %1120 = vtanh.f32 %v437_v40  ;;  %v435_v43 = vmul.f32 0.5, %v387_v41  ;;  %v408_v44 = vadd.f32 %v1028_v42, %v1267_v18 }
  0xe6   : > { %v399_v45 = vpop.f32.mrf.mxu0 }
  0xe7   : > { %1122 = vtanh.f32 %v435_v43  ;;  %v400_v46 = vadd.f32 %v1267_v18, %v399_v45  ;;  %v440_v48 = vmul.f32 0.5, %v408_v44 }
  0xe8   : > { %v1109_v47 = vpop.eup %1108  ;;  %v1029_v49 = vpop.f32.mrf.mxu0 }
  0xe9   : > { %v1111_v50 = vpop.eup %1110  ;;  %v438_v51 = vmul.f32 0.5, %v400_v46  ;;  %v411_v53 = vadd.f32 %v1029_v49, %v1267_v18  ;;  %v462_v55 = vmul.f32 0.5, %v1109_v47 }
  0xea   : > { %v1113_v52 = vpop.eup %1112  ;;  %v402_v54 = vpop.f32.mrf.mxu0  ;;  %v464_v59 = vmul.f32 0.5, %v1111_v50 }
  0xeb   : > { %v465_v56 = vmul.f32 0.5, %v1113_v52  ;;  %1124 = vtanh.f32 %v438_v51  ;;  %v403_v57 = vadd.f32 %v1267_v18, %v402_v54  ;;  %v441_v60 = vmul.f32 0.5, %v411_v53 }
  0xec   : > { %v1115_v58 = vpop.eup %1114  ;;  %1126 = vtanh.f32 %v440_v48  ;;  %v1032_v61 = vpop.f32.mrf.mxu0  ;;  %v478_v3 = vadd.f32 0.5, %v462_v55  ;;  %v480_v6 = vadd.f32 0.5, %v464_v59  ;;  %v1288_v59 = vld [vmem:[%s1328_s4] ss:$0 sm:$0xff] }
  0xed   : > { %v463_v62 = vmul.f32 0.5, %v1115_v58  ;;  %v439_v63 = vmul.f32 0.5, %v403_v57  ;;  %v424_v0 = vadd.f32 %v1032_v61, %v1267_v18  ;;  %v481_v1 = vadd.f32 0.5, %v465_v56 }
  0xee   : > { %1128 = vtanh.f32 %v441_v60  ;;  %v415_v2 = vpop.f32.mrf.mxu0 }
  0xef   : > { %v479_v4 = vadd.f32 0.5, %v463_v62  ;;  %1130 = vtanh.f32 %v439_v63  ;;  %v444_v7 = vmul.f32 0.5, %v424_v0  ;;  %v416_v8 = vadd.f32 %v1267_v18, %v415_v2 }
  0xf0   : > { %v1117_v5 = vpop.eup %1116  ;;  %v1033_v9 = vpop.f32.mrf.mxu0  ;;  %v495_v14 = vpack.c.bf16 %v481_v1, %v480_v6 }
  0xf1   : > { %v1119_v10 = vpop.eup %1118  ;;  %v427_v11 = vadd.f32 %v1033_v9, %v1267_v18  ;;  %v494_v12 = vpack.c.bf16 %v479_v4, %v478_v3  ;;  %v442_v15 = vmul.f32 0.5, %v416_v8  ;;  %v466_v17 = vmul.f32 0.5, %v1117_v5 }
  0xf2   : > { %v1121_v13 = vpop.eup %1120  ;;  %v418_v16 = vpop.f32.mrf.mxu0  ;;  %1132 = vtanh.f32 %v444_v7  ;;  %v468_v23 = vmul.f32 0.5, %v1119_v10 }
  0xf3   : > { %v469_v19 = vmul.f32 0.5, %v1121_v13  ;;  %v445_v20 = vmul.f32 0.5, %v427_v11  ;;  %v419_v21 = vadd.f32 %v1267_v18, %v418_v16  ;;  %1050 = vmatprep.mubr.bf16.mxu0 %v494_v12  ;;  %1134 = vtanh.f32 %v442_v15 }
  0xf4   : > { %v1123_v22 = vpop.eup %1122  ;;  %1051 = vmatmul.mubr.bf16.vlgmr.msra.gmra.mxu0 %v495_v14  ;;  %v482_v27 = vadd.f32 0.5, %v466_v17  ;;  %v484_v30 = vadd.f32 0.5, %v468_v23 }
  0xf5   : > { %1136 = vtanh.f32 %v445_v20  ;;  %v443_v24 = vmul.f32 0.5, %v419_v21  ;;  %v467_v25 = vmul.f32 0.5, %v1123_v22  ;;  %v485_v26 = vadd.f32 0.5, %v469_v19 }
  0xf7   : > { %1138 = vtanh.f32 %v443_v24  ;;  %v483_v28 = vadd.f32 0.5, %v467_v25  ;;  %v497_v33 = vpack.c.bf16 %v485_v26, %v484_v30 }
  0xf8   : > { %v1125_v29 = vpop.eup %1124 }
  0xf9   : > { %v1127_v31 = vpop.eup %1126  ;;  %v496_v32 = vpack.c.bf16 %v483_v28, %v482_v27  ;;  %v470_v35 = vmul.f32 0.5, %v1125_v29 }
  0xfa   : > { %v472_v36 = vmul.f32 0.5, %v1127_v31 }
  0xfb   : > { %v1129_v34 = vpop.eup %1128  ;;  %1054 = vmatprep.mubr.bf16.mxu1 %v496_v32  ;;  %v486_v40 = vadd.f32 0.5, %v470_v35 }
  0xfc   : > { %v1131_v18 = vpop.eup %1130  ;;  %v473_v37 = vmul.f32 0.5, %v1129_v34  ;;  %1055 = vmatmul.mubr.bf16.vlgmr.msra.gmra.mxu1 %v497_v33  ;;  %v488_v43 = vadd.f32 0.5, %v472_v36 }
  0xfd   : > { %v471_v38 = vmul.f32 0.5, %v1131_v18 }
  0xfe   : > { %v489_v39 = vadd.f32 0.5, %v473_v37 }
  0xff   : > { %v487_v41 = vadd.f32 0.5, %v471_v38  ;;  %v1133_v42 = vpop.eup %1132 }
 0x100   : > { %v1135_v44 = vpop.eup %1134  ;;  %v499_v47 = vpack.c.bf16 %v489_v39, %v488_v43  ;;  %v476_v51 = vmul.f32 0.5, %v1133_v42 }
 0x101   : > { %v498_v45 = vpack.c.bf16 %v487_v41, %v486_v40  ;;  %v474_v48 = vmul.f32 0.5, %v1135_v44 }
 0x102   : > { %v1137_v46 = vpop.eup %1136  ;;  %v492_v56 = vadd.f32 0.5, %v476_v51 }
 0x103   : > { %v477_v49 = vmul.f32 0.5, %v1137_v46  ;;  %1058 = vmatprep.mubr.bf16.mxu1 %v498_v45  ;;  %v490_v54 = vadd.f32 0.5, %v474_v48 }
 0x104   : > { %v1139_v50 = vpop.eup %1138  ;;  %1059 = vmatmul.mubr.bf16.gmra.mxu1 %v499_v47 }
 0x105   : > { %v475_v52 = vmul.f32 0.5, %v1139_v50  ;;  %v493_v53 = vadd.f32 0.5, %v477_v49 }
 0x107   : > { %v491_v55 = vadd.f32 0.5, %v475_v52  ;;  %v501_v58 = vpack.c.bf16 %v493_v53, %v492_v56 }
 0x109   : > { %v500_v57 = vpack.c.bf16 %v491_v55, %v490_v54 }
 0x10b   : > { %1062 = vmatprep.mubr.bf16.mxu1 %v500_v57 }
 0x10c   : > { %1063 = vmatmul.mubr.bf16.gmra.mxu1 %v501_v58 }
 0x1b4   : > { %v1052_v60 = vpop.f32.mrf.mxu0 }
 0x1b5   : > { %v616_v61 = vadd.f32 %v1052_v60, %v1288_v59 }
 0x1b6   : > { %v607_v62 = vpop.f32.mrf.mxu0 }
 0x1b7   : > { %v672_v63 = vmul.f32 0.5, %v616_v61  ;;  %v608_v0 = vadd.f32 %v1288_v59, %v607_v62 }
 0x1b8   : > { %v1053_v1 = vpop.f32.mrf.mxu0 }
 0x1b9   : > { %1140 = vtanh.f32 %v672_v63  ;;  %v670_v2 = vmul.f32 0.5, %v608_v0  ;;  %v619_v3 = vadd.f32 %v1053_v1, %v1288_v59 }
 0x1ba   : > { %v610_v4 = vpop.f32.mrf.mxu0 }
 0x1bb   : > { %1142 = vtanh.f32 %v670_v2  ;;  %v673_v5 = vmul.f32 0.5, %v619_v3  ;;  %v611_v6 = vadd.f32 %v1288_v59, %v610_v4 }
 0x1bc   : > { %v1056_v7 = vpop.f32.mrf.mxu1 }
 0x1bd   : > { %1144 = vtanh.f32 %v673_v5  ;;  %v671_v8 = vmul.f32 0.5, %v611_v6  ;;  %v632_v9 = vadd.f32 %v1056_v7, %v1288_v59 }
 0x1be   : > { %v623_v10 = vpop.f32.mrf.mxu1 }
 0x1bf   : > { %1146 = vtanh.f32 %v671_v8  ;;  %v676_v11 = vmul.f32 0.5, %v632_v9  ;;  %v624_v12 = vadd.f32 %v1288_v59, %v623_v10 }
 0x1c0   : > { %v1057_v13 = vpop.f32.mrf.mxu1 }
 0x1c1   : > { %1148 = vtanh.f32 %v676_v11  ;;  %v674_v14 = vmul.f32 0.5, %v624_v12  ;;  %v635_v15 = vadd.f32 %v1057_v13, %v1288_v59 }
 0x1c2   : > { %v626_v16 = vpop.f32.mrf.mxu1 }
 0x1c3   : > { %1150 = vtanh.f32 %v674_v14  ;;  %v677_v17 = vmul.f32 0.5, %v635_v15  ;;  %v627_v19 = vadd.f32 %v1288_v59, %v626_v16 }
 0x1c4   : > { %v1060_v20 = vpop.f32.mrf.mxu1 }
 0x1c5   : > { %1152 = vtanh.f32 %v677_v17  ;;  %v675_v21 = vmul.f32 0.5, %v627_v19  ;;  %v648_v22 = vadd.f32 %v1060_v20, %v1288_v59 }
 0x1c6   : > { %v1141_v23 = vpop.eup %1140  ;;  %v639_v24 = vpop.f32.mrf.mxu1 }
 0x1c7   : > { %1154 = vtanh.f32 %v675_v21  ;;  %v680_v25 = vmul.f32 0.5, %v648_v22  ;;  %v640_v26 = vadd.f32 %v1288_v59, %v639_v24  ;;  %v704_v28 = vmul.f32 0.5, %v1141_v23 }
 0x1c8   : > { %v1143_v27 = vpop.eup %1142  ;;  %v1061_v29 = vpop.f32.mrf.mxu1 }
 0x1c9   : > { %v678_v30 = vmul.f32 0.5, %v640_v26  ;;  %1156 = vtanh.f32 %v680_v25  ;;  %v651_v32 = vadd.f32 %v1061_v29, %v1288_v59  ;;  %v702_v34 = vmul.f32 0.5, %v1143_v27 }
 0x1ca   : > { %v1145_v31 = vpop.eup %1144  ;;  %v642_v33 = vpop.f32.mrf.mxu1  ;;  %v720_v37 = vadd.f32 0.5, %v704_v28 }
 0x1cb   : > { %v705_v35 = vmul.f32 0.5, %v1145_v31  ;;  %1158 = vtanh.f32 %v678_v30  ;;  %v643_v18 = vadd.f32 %v1288_v59, %v642_v33  ;;  %v681_v38 = vmul.f32 0.5, %v651_v32 }
 0x1cc   : > { %v1147_v36 = vpop.eup %1146  ;;  %v1064_v39 = vpop.f32.mrf.mxu1  ;;  %v718_v46 = vadd.f32 0.5, %v702_v34 }
 0x1cd   : > { %v721_v40 = vadd.f32 0.5, %v705_v35  ;;  %v703_v41 = vmul.f32 0.5, %v1147_v36  ;;  %v679_v42 = vmul.f32 0.5, %v643_v18  ;;  %v664_v43 = vadd.f32 %v1064_v39, %v1288_v59 }
 0x1ce   : > { %v1149_v44 = vpop.eup %1148  ;;  %1160 = vtanh.f32 %v681_v38  ;;  %v655_v45 = vpop.f32.mrf.mxu1 }
 0x1cf   : > { %v949_v47 = vpack.c.bf16 %v721_v40, %v720_v37  ;;  %v719_v48 = vadd.f32 0.5, %v703_v41  ;;  %1162 = vtanh.f32 %v679_v42  ;;  %v708_v50 = vmul.f32 0.5, %v1149_v44 }
 0x1d0   : > { %v1151_v49 = vpop.eup %1150  ;;  %v684_v51 = vmul.f32 0.5, %v664_v43  ;;  %v656_v52 = vadd.f32 %v1288_v59, %v655_v45  ;;  %v1065_v53 = vpop.f32.mrf.mxu1 }
 0x1d1   : > { %981 = vst [vmem:[%s1308_s29 + $0x8] sm:$0xff] %v949_v47   ;;  %v944_v54 = vpack.c.bf16 %v719_v48, %v718_v46  ;;  %v667_v55 = vadd.f32 %v1065_v53, %v1288_v59  ;;  %v706_v60 = vmul.f32 0.5, %v1151_v49  ;;  %v724_v1 = vadd.f32 0.5, %v708_v50 }
 0x1d2   : > { %v1153_v56 = vpop.eup %1152  ;;  %1164 = vtanh.f32 %v684_v51  ;;  %v682_v57 = vmul.f32 0.5, %v656_v52  ;;  %v658_v58 = vpop.f32.mrf.mxu1 }
 0x1d3   : > { %945 = vst [vmem:[%s1308_s29] sm:$0xff] %v944_v54   ;;  %v709_v61 = vmul.f32 0.5, %v1153_v56  ;;  %v685_v62 = vmul.f32 0.5, %v667_v55  ;;  %v659_v63 = vadd.f32 %v1288_v59, %v658_v58  ;;  %v722_v6 = vadd.f32 0.5, %v706_v60 }
 0x1d4   : > { %v1155_v0 = vpop.eup %1154  ;;  %1166 = vtanh.f32 %v682_v57 }
 0x1d5   : > { %v725_v2 = vadd.f32 0.5, %v709_v61  ;;  %v707_v3 = vmul.f32 0.5, %v1155_v0  ;;  %1168 = vtanh.f32 %v685_v62  ;;  %v683_v4 = vmul.f32 0.5, %v659_v63 }
 0x1d6   : > { %v1157_v5 = vpop.eup %1156 }
 0x1d7   : > { %v959_v7 = vpack.c.bf16 %v725_v2, %v724_v1  ;;  %v723_v8 = vadd.f32 0.5, %v707_v3  ;;  %1170 = vtanh.f32 %v683_v4  ;;  %v712_v11 = vmul.f32 0.5, %v1157_v5 }
 0x1d8   : > { %v1159_v9 = vpop.eup %1158 }
 0x1d9   : > { %983 = vst [vmem:[%s1308_s29 + $0x18] sm:$0xff] %v959_v7   ;;  %v954_v10 = vpack.c.bf16 %v723_v8, %v722_v6  ;;  %v710_v59 = vmul.f32 0.5, %v1159_v9  ;;  %v728_v16 = vadd.f32 0.5, %v712_v11 }
 0x1db   : > { %v1161_v12 = vpop.eup %1160  ;;  %982 = vst [vmem:[%s1308_s29 + $0x10] sm:$0xff] %v954_v10   ;;  %v726_v20 = vadd.f32 0.5, %v710_v59 }
 0x1dc   : > { %v1163_v13 = vpop.eup %1162  ;;  %v713_v14 = vmul.f32 0.5, %v1161_v12 }
 0x1dd   : > { %v711_v15 = vmul.f32 0.5, %v1163_v13 }
 0x1de   : > { %v729_v17 = vadd.f32 0.5, %v713_v14 }
 0x1df   : > { %v1165_v19 = vpop.eup %1164  ;;  %v727_v21 = vadd.f32 0.5, %v711_v15 }
 0x1e0   : > { %v969_v22 = vpack.c.bf16 %v729_v17, %v728_v16  ;;  %v716_v25 = vmul.f32 0.5, %v1165_v19 }
 0x1e1   : > { %v1167_v23 = vpop.eup %1166  ;;  %v964_v24 = vpack.c.bf16 %v727_v21, %v726_v20 }
 0x1e2   : > { %v1169_v26 = vpop.eup %1168  ;;  %985 = vst [vmem:[%s1308_s29 + $0x28] sm:$0xff] %v969_v22   ;;  %v714_v27 = vmul.f32 0.5, %v1167_v23  ;;  %v732_v30 = vadd.f32 0.5, %v716_v25 }
 0x1e3   : > { %984 = vst [vmem:[%s1308_s29 + $0x20] sm:$0xff] %v964_v24   ;;  %v717_v28 = vmul.f32 0.5, %v1169_v26 }
 0x1e4   : > { %v1171_v29 = vpop.eup %1170  ;;  %v730_v33 = vadd.f32 0.5, %v714_v27 }
 0x1e5   : > { %v733_v31 = vadd.f32 0.5, %v717_v28  ;;  %v715_v32 = vmul.f32 0.5, %v1171_v29 }
 0x1e7   : > { %v979_v34 = vpack.c.bf16 %v733_v31, %v732_v30  ;;  %v731_v35 = vadd.f32 0.5, %v715_v32 }
 0x1e9   : > { %987 = vst [vmem:[%s1308_s29 + $0x38] sm:$0xff] %v979_v34   ;;  %v974_v18 = vpack.c.bf16 %v731_v35, %v730_v33 }
 0x1eb   : > { %986 = vst [vmem:[%s1308_s29 + $0x30] sm:$0xff] %v974_v18  }
 0x1ec PF: > { %s15_s18 = sadd.s32 1, %s1178_s18  }
 0x1ed   : > { %p12_p4 = scmp.ge.s32.totalorder %s15_s18, 4  }
 0x1ef   :  { %14 = sbr.rel (!%p12_p4) target bundleno = 1 (0x1), region = 70 }

</bundles_post_ra>
